<compile_context>
chip_gen: v6e
topology: v6e:2x2x1
jax: 0.10.0
libtpu: 0.0.40
codegen_flags: <defaults>
</compile_context>

<pallas_src>
import collections
import functools

import jax
import jax.numpy as jnp
from jax import lax
from jax.experimental import pallas as pl
from jax.experimental.pallas import tpu as pltpu


# ----------------------------------------------------------------------------
# Small helpers
# ----------------------------------------------------------------------------
def _round_up(x, m):
    return ((x + m - 1) // m) * m


def _layernorm(x, g, b, eps=1e-12):
    mu = jnp.mean(x, axis=-1, keepdims=True)
    var = jnp.mean((x - mu) ** 2, axis=-1, keepdims=True)
    return (x - mu) * lax.rsqrt(var + eps) * g + b


def _gelu(x):
    # TODO(synk): HF BERT uses exact erf-GELU; tanh approximation kept here
    # (EUP tanh, v5e-safe) — small systematic numeric drift vs. the reference.
    return 0.5 * x * (1.0 + jnp.tanh(0.7978845608028654 * (x + 0.044715 * x * x * x)))


def _choose_batch_block(B, S, target_m=256):
    """Largest divisor of B with BB*S <= target (MXU rows) while keeping >=2
    grid steps when possible (v7x megacore + pipelining)."""
    best = 1
    for d in range(1, B + 1):
        if B % d != 0:
            continue
        nb = B // d
        if d * S <= max(S, target_m) and (nb >= 2 or B == 1):
            best = d
    return best


def _choose_row_block(M, target=256):
    """Row tile for the pano kernel: ~256 rows when M is large, otherwise split
    into >=2 blocks (multiple of 16 rows for bf16 sublane packing)."""
    if M >= 2 * target:
        return target
    return max(16, _round_up((M + 1) // 2, 16))


# ----------------------------------------------------------------------------
# Kernel 1: text encoder layer (fused QKV, self-attention + FFN + LayerNorms)
# ----------------------------------------------------------------------------
def txt_layer_kernel(x_ref, lens_ref, wqkv_ref, bqkv_ref, wo_ref, bo_ref, ln_ref,
                     w1_ref, b1_ref, w2_ref, b2_ref, o_ref, *, batch_block, ffn_block):
    BB = batch_block
    x = x_ref[...]                                   # (BB, S, H) f32, S % 8 == 0
    S, H = x.shape[1], x.shape[2]
    M = BB * S
    x2 = x.reshape(M, H)                             # copy-free (S padded to 8)

    # Fused QKV projection: one (M, H) x (H, 3H) bf16 matmul, f32 accumulate.
    qkv = jnp.dot(x2.astype(jnp.bfloat16), wqkv_ref[...],
                  preferred_element_type=jnp.float32) + bqkv_ref[...]
    q = qkv[:, 0 * H:1 * H].reshape(BB, S, H)
    k = qkv[:, 1 * H:2 * H].reshape(BB, S, H)
    v = qkv[:, 2 * H:3 * H].reshape(BB, S, H)

    # Batched attention scores (bf16 MXU, f32 accumulation).
    s = jnp.einsum('bqd,bkd->bqk', q.astype(jnp.bfloat16), k.astype(jnp.bfloat16),
                   preferred_element_type=jnp.float32)
    s = s * (1.0 / jnp.sqrt(jnp.float32(H)))

    # Additive key mask: single broadcast compare against the (BB, 1, 1) int32
    # lengths block (no per-row select chain).
    key_pos = lax.broadcasted_iota(jnp.int32, (BB, 1, S), 2)
    add_mask = jnp.where(key_pos < lens_ref[...], 0.0, -1e9).astype(jnp.float32)
    s = s + add_mask                                 # broadcast over query dim

    # Softmax in f32; denominator via EUP reciprocal (free slot) + VPU multiply.
    s = s - jnp.max(s, axis=-1, keepdims=True)
    p = jnp.exp(s)
    p = p * pl.reciprocal(jnp.sum(p, axis=-1, keepdims=True), approx=True)

    ctx = jnp.einsum('bqk,bkd->bqd', p.astype(jnp.bfloat16), v.astype(jnp.bfloat16),
                     preferred_element_type=jnp.float32).reshape(M, H)
    attn = jnp.dot(ctx.astype(jnp.bfloat16), wo_ref[...],
                   preferred_element_type=jnp.float32) + bo_ref[...]
    h = _layernorm(x2 + attn, ln_ref[0], ln_ref[1])
    h_bf = h.astype(jnp.bfloat16)

    # FFN.  For production sizes (F=3072) the intermediate is tiled over F so
    # the (M, F) live range stays bounded in VMEM (v5e 16 MiB / v7x 64 MiB).
    F = w1_ref.shape[1]
    fb = ffn_block
    if F <= fb:
        ff = _gelu(jnp.dot(h_bf, w1_ref[...],
                           preferred_element_type=jnp.float32) + b1_ref[...])
        ffn = jnp.dot(ff.astype(jnp.bfloat16), w2_ref[...],
                      preferred_element_type=jnp.float32) + b2_ref[...]
    else:
        def ffn_chunk(c, acc):
            f0 = pl.multiple_of(c * fb, fb)
            ff = jnp.dot(h_bf, w1_ref[:, pl.ds(f0, fb)],
                         preferred_element_type=jnp.float32) + b1_ref[:, pl.ds(f0, fb)]
            ff = _gelu(ff)
            return acc + jnp.dot(ff.astype(jnp.bfloat16), w2_ref[pl.ds(f0, fb), :],
                                 preferred_element_type=jnp.float32)
        ffn = lax.fori_loop(0, F // fb, ffn_chunk,
                            jnp.zeros((M, H), jnp.float32)) + b2_ref[...]

    o_ref[...] = _layernorm(h + ffn, ln_ref[2], ln_ref[3]).reshape(BB, S, H)


def txt_encoder(x, txt_lens, params, batch_block=None, ffn_block=512,
                vmem_limit_bytes=32 * 1024 * 1024):
    B, S, H = x.shape
    F = params['w_ffn1'].shape[-1]

    # Pad S to a multiple of 8 once in HBM (keeps in-kernel reshapes copy-free;
    # padded key positions are masked via txt_lens, padded queries sliced off).
    S_pad = _round_up(S, 8)
    if S_pad != S:
        x = jnp.pad(x, ((0, 0), (0, S_pad - S), (0, 0)))

    BB = _choose_batch_block(B, S_pad) if batch_block is None else min(batch_block, B)
    assert B % BB == 0
    nb = B // BB

    fb = min(F, ffn_block)
    assert F % fb == 0

    lens3 = txt_lens.reshape(B, 1, 1).astype(jnp.int32)

    gs = pltpu.PrefetchScalarGridSpec(
        num_scalar_prefetch=0,
        grid=(nb,),
        in_specs=[
            pl.BlockSpec((BB, S_pad, H), lambda b: (b, 0, 0)),
            pl.BlockSpec((BB, 1, 1), lambda b: (b, 0, 0)),
            pl.BlockSpec((H, 3 * H), lambda b: (0, 0)),
            pl.BlockSpec((1, 3 * H), lambda b: (0, 0)),
            pl.BlockSpec((H, H), lambda b: (0, 0)),
            pl.BlockSpec((1, H), lambda b: (0, 0)),
            pl.BlockSpec((4, 1, H), lambda b: (0, 0, 0)),
            pl.BlockSpec((H, F), lambda b: (0, 0)),
            pl.BlockSpec((1, F), lambda b: (0, 0)),
            pl.BlockSpec((F, H), lambda b: (0, 0)),
            pl.BlockSpec((1, H), lambda b: (0, 0)),
        ],
        out_specs=pl.BlockSpec((BB, S_pad, H), lambda b: (b, 0, 0)),
    )
    out = pl.pallas_call(
        functools.partial(txt_layer_kernel, batch_block=BB, ffn_block=fb),
        out_shape=jax.ShapeDtypeStruct((B, S_pad, H), jnp.float32),
        grid_spec=gs,
        compiler_params=pltpu.CompilerParams(
            dimension_semantics=("parallel",),
            vmem_limit_bytes=vmem_limit_bytes),   # raise / tune for H=768,F=3072
    )(x, lens3, params['w_qkv'], params['b_qkv'], params['w_o'], params['b_o'],
      params['ln_txt'], params['w_ffn1'], params['b_ffn1'],
      params['w_ffn2'], params['b_ffn2'])
    return out[:, :S, :]


# ----------------------------------------------------------------------------
# Kernel 2: panorama encoder with fused feature dropout.
#           Row-tiled over M = B*V (parallel axis), bf16 inputs, angle
#           projection pre-computed in XLA (lane-dense (M, H) addend).
# ----------------------------------------------------------------------------
def _pano_core(img_bf16, angp_ref, w_img_ref, b_ref, ln_ref, o_ref):
    h = jnp.dot(img_bf16, w_img_ref[...], preferred_element_type=jnp.float32)
    h = h + angp_ref[...].astype(jnp.float32) + b_ref[...]
    o_ref[...] = _layernorm(h, ln_ref[0], ln_ref[1])


def pano_kernel_train(img_ref, keep_ref, angp_ref, w_img_ref, b_ref, ln_ref, o_ref):
    # Fused nn.Dropout(featdropout): keep_ref is the pre-scaled bf16 keep mask.
    _pano_core(img_ref[...] * keep_ref[...], angp_ref, w_img_ref, b_ref, ln_ref, o_ref)


def pano_kernel_eval(img_ref, angp_ref, w_img_ref, b_ref, ln_ref, o_ref):
    _pano_core(img_ref[...], angp_ref, w_img_ref, b_ref, ln_ref, o_ref)


def pano_encoder(view_img_fts, view_ang_fts, params, keep_mask=None, row_block=None,
                 vmem_limit_bytes=32 * 1024 * 1024):
    B, V, D_img = view_img_fts.shape
    H = params['w_img'].shape[-1]
    M = B * V

    # Angle projection has K = 4: keep the tiny matmul in XLA and feed the
    # kernel a lane-dense (M, H) bf16 addend (no (M, 4) masked-lane block).
    ang_proj = jnp.einsum('bvk,kh->bvh', view_ang_fts, params['w_ang'])
    ang_proj = ang_proj.reshape(M, H).astype(jnp.bfloat16)

    img2 = view_img_fts.reshape(M, D_img).astype(jnp.bfloat16)
    operands = [img2]
    if keep_mask is not None:
        operands.append(keep_mask.reshape(M, D_img).astype(jnp.bfloat16))
    operands.append(ang_proj)

    RB = _choose_row_block(M) if row_block is None else row_block
    M_pad = _round_up(M, RB)
    if M_pad != M:
        operands = [jnp.pad(o, ((0, M_pad - M), (0, 0))) for o in operands]
    nb = M_pad // RB

    row_img_spec = pl.BlockSpec((RB, D_img), lambda i: (i, 0))
    row_h_spec = pl.BlockSpec((RB, H), lambda i: (i, 0))
    in_specs = [row_img_spec]
    if keep_mask is not None:
        in_specs.append(row_img_spec)
    in_specs += [
        row_h_spec,
        pl.BlockSpec((D_img, H), lambda i: (0, 0)),
        pl.BlockSpec((1, H), lambda i: (0, 0)),
        pl.BlockSpec((2, 1, H), lambda i: (0, 0, 0)),
    ]
    kernel = pano_kernel_train if keep_mask is not None else pano_kernel_eval

    gs = pltpu.PrefetchScalarGridSpec(
        num_scalar_prefetch=0,
        grid=(nb,),
        in_specs=in_specs,
        out_specs=pl.BlockSpec((RB, H), lambda i: (i, 0)),
    )
    out = pl.pallas_call(
        kernel,
        out_shape=jax.ShapeDtypeStruct((M_pad, H), jnp.float32),
        grid_spec=gs,
        compiler_params=pltpu.CompilerParams(
            dimension_semantics=("parallel",),
            vmem_limit_bytes=vmem_limit_bytes),
    )(*operands, params['w_img'], params['b_pano'], params['ln_pano'])
    return out[:M].reshape(B, V, H)


# ----------------------------------------------------------------------------
# Navigation scoring: B*V*H multiply-reduce + mask.  Kept in plain XLA per the
# performance review — a standalone pallas_call is launch-overhead dominated
# and its (B, V=12) output forces masked partial stores.
# ----------------------------------------------------------------------------
def nav_logits(pano_embeds, txt_cls, pano_masks):
    H = pano_embeds.shape[-1]
    scores = jnp.einsum('bvh,bh->bv', pano_embeds, txt_cls) * (1.0 / jnp.sqrt(jnp.float32(H)))
    return jnp.where(pano_masks, scores, jnp.float32(-1e9))


# ----------------------------------------------------------------------------
# Dropout keep mask (pre-scaled, bf16) — generated with jax.random in the
# wrapper, consumed fused inside the pano kernel.
# ----------------------------------------------------------------------------
def dropout_keep_mask(key, shape, rate):
    if rate <= 0.0:
        return None
    keep = jax.random.bernoulli(key, 1.0 - rate, shape).astype(jnp.float32)
    return (keep * (1.0 / (1.0 - rate))).astype(jnp.bfloat16)


# ----------------------------------------------------------------------------
# VLNBERTDUET wrapper (mode dispatch identical to the PyTorch module)
# ----------------------------------------------------------------------------
class VLNBERTDUETPallas:
    def __init__(self, featdropout=0.3, vocab=100, hidden=128, ffn=256,
                 img_dim=128, ang_dim=4, max_txt_len=8):
        self.featdropout = float(featdropout)

        def _init(k, shape, scale=0.02):
            return scale * jax.random.normal(k, shape, jnp.float32)

        keys = jax.random.split(jax.random.PRNGKey(0), 8)
        ones = jnp.ones((1, 1, hidden), jnp.float32)
        zeros = jnp.zeros((1, 1, hidden), jnp.float32)
        self.params = {
            'txt_embed': _init(keys[0], (vocab, hidden)),
            'txt_pos':   _init(keys[1], (max_txt_len, hidden)),
            # bf16 matmul weights halve weight DMA bytes; f32 accumulation in-kernel.
            'w_qkv':     _init(keys[2], (hidden, 3 * hidden)).astype(jnp.bfloat16),
            'b_qkv':     jnp.zeros((1, 3 * hidden), jnp.float32),
            'w_o':       _init(keys[3], (hidden, hidden)).astype(jnp.bfloat16),
            'b_o':       jnp.zeros((1, hidden), jnp.float32),
            'ln_txt':    jnp.concatenate([ones, zeros, ones, zeros], 0),  # g1,b1,g2,b2
            'w_ffn1':    _init(keys[4], (hidden, ffn)).astype(jnp.bfloat16),
            'b_ffn1':    jnp.zeros((1, ffn), jnp.float32),
            'w_ffn2':    _init(keys[5], (ffn, hidden)).astype(jnp.bfloat16),
            'b_ffn2':    jnp.zeros((1, hidden), jnp.float32),
            'w_img':     _init(keys[6], (img_dim, hidden)).astype(jnp.bfloat16),
            'w_ang':     _init(keys[7], (ang_dim, hidden)),   # f32, used in XLA
            'b_pano':    jnp.zeros((1, hidden), jnp.float32),
            'ln_pano':   jnp.concatenate([ones, zeros], 0),   # g, b
        }

    def __call__(self, mode, batch, dropout_seed=0, training=True):
        batch = collections.defaultdict(lambda: None, dict(batch))
        if mode == 'language':
            ids = batch['txt_ids']
            masks = batch['txt_masks']
            S = ids.shape[1]
            # Embedding gather + positional add kept in plain JAX.
            x = self.params['txt_embed'][ids] + self.params['txt_pos'][:S][None]
            txt_lens = jnp.sum(masks.astype(jnp.int32), axis=1).astype(jnp.int32)
            return txt_encoder(x, txt_lens, self.params)
        elif mode == 'panorama':
            view = batch['view_img_fts']
            keep = None
            if training and self.featdropout > 0.0:
                key = jax.random.PRNGKey(dropout_seed)
                k_view, k_obj = jax.random.split(key)
                keep = dropout_keep_mask(k_view, view.shape, self.featdropout)
                if batch['obj_img_fts'] is not None:
                    keep_obj = dropout_keep_mask(k_obj, batch['obj_img_fts'].shape,
                                                 self.featdropout)
                    batch['obj_img_fts'] = (batch['obj_img_fts']
                                            * keep_obj.astype(jnp.float32))
                    # TODO(synk): object branch of the DUET pano encoder is not
                    # reproduced; obj features are only dropout-regularized here.
            pano_embeds = pano_encoder(view, batch['view_ang_fts'], self.params,
                                       keep_mask=keep)
            V = view.shape[1]
            pano_masks = jnp.arange(V)[None, :] < batch['view_lens'][:, None]
            return (pano_embeds, pano_masks)
        elif mode == 'navigation':
            txt_cls = batch['txt_embeds'][:, 0, :]
            return nav_logits(batch['pano_embeds'], txt_cls, batch['pano_masks'])
        else:
            raise NotImplementedError('wrong mode: %s' % mode)


# ----------------------------------------------------------------------------
# Demo
# ----------------------------------------------------------------------------
if __name__ == "__main__":
    B, S, V, NOBJ = 2, 8, 12, 4
    H, IMG, ANG = 128, 128, 4

    model = VLNBERTDUETPallas(featdropout=0.3, vocab=100, hidden=H, ffn=256,
                              img_dim=IMG, ang_dim=ANG, max_txt_len=S)

    key = jax.random.PRNGKey(0)
    k1, k2, k3, k4 = jax.random.split(key, 4)
    txt_ids = jax.random.randint(k1, (B, S), 0, 100)
    txt_masks = jnp.ones((B, S), jnp.int32).at[1, 6:].set(0)

    txt_embeds = model('language', {'txt_ids': txt_ids, 'txt_masks': txt_masks})

    view_img_fts = jax.random.normal(k2, (B, V, IMG), jnp.float32)
    view_ang_fts = jax.random.normal(k3, (B, V, ANG), jnp.float32)
    obj_img_fts = jax.random.normal(k4, (B, NOBJ, IMG), jnp.float32)
    view_lens = jnp.array([12, 9], jnp.int32)

    pano_embeds, pano_masks = model('panorama', {
        'view_img_fts': view_img_fts,
        'view_ang_fts': view_ang_fts,
        'obj_img_fts': obj_img_fts,
        'view_lens': view_lens,
    })

    logits = model('navigation', {
        'txt_embeds': txt_embeds,
        'pano_embeds': pano_embeds,
        'pano_masks': pano_masks,
    })

    jax.block_until_ready((txt_embeds, pano_embeds, pano_masks, logits))
    assert txt_embeds.shape == (B, S, H)
    assert pano_embeds.shape == (B, V, H)
    assert pano_masks.shape == (B, V)
    assert logits.shape == (B, V)
    assert bool(jnp.all(jnp.isfinite(txt_embeds)))
    assert bool(jnp.all(jnp.isfinite(pano_embeds)))
    print("KERNEL_OK")
</pallas_src>

<mosaic_0001>
module attributes {stable_mosaic.version = 11 : i64} {
  func.func @txt_layer_kernel(%arg0: i32, %arg1: memref<1x8x128xf32, #tpu.memory_space<vmem>>, %arg2: memref<1x1x1xi32, #tpu.memory_space<vmem>>, %arg3: memref<128x384xbf16, #tpu.memory_space<vmem>>, %arg4: memref<1x384xf32, #tpu.memory_space<vmem>>, %arg5: memref<128x128xbf16, #tpu.memory_space<vmem>>, %arg6: memref<1x128xf32, #tpu.memory_space<vmem>>, %arg7: memref<4x1x128xf32, #tpu.memory_space<vmem>>, %arg8: memref<128x256xbf16, #tpu.memory_space<vmem>>, %arg9: memref<1x256xf32, #tpu.memory_space<vmem>>, %arg10: memref<256x128xbf16, #tpu.memory_space<vmem>>, %arg11: memref<1x128xf32, #tpu.memory_space<vmem>>, %arg12: memref<1x8x128xf32, #tpu.memory_space<vmem>>) attributes {dimension_semantics = [#tpu.dimension_semantics<parallel>], iteration_bounds = array<i64: 2>, scalar_prefetch = 0 : i64, scratch_operands = 0 : i64, tpu.core_type = #tpu.core_type<tc>, window_params = [{transform_indices = @transform_0, window_bounds = array<i64: 1, 8, 128>}, {transform_indices = @transform_1, window_bounds = array<i64: 1, 1, 1>}, {pipeline_mode = #tpu.pipeline_mode<synchronous>, transform_indices = @transform_2, window_bounds = array<i64: 128, 384>}, {pipeline_mode = #tpu.pipeline_mode<synchronous>, transform_indices = @transform_3, window_bounds = array<i64: 1, 384>}, {pipeline_mode = #tpu.pipeline_mode<synchronous>, transform_indices = @transform_4, window_bounds = array<i64: 128, 128>}, {pipeline_mode = #tpu.pipeline_mode<synchronous>, transform_indices = @transform_5, window_bounds = array<i64: 1, 128>}, {pipeline_mode = #tpu.pipeline_mode<synchronous>, transform_indices = @transform_6, window_bounds = array<i64: 4, 1, 128>}, {pipeline_mode = #tpu.pipeline_mode<synchronous>, transform_indices = @transform_7, window_bounds = array<i64: 128, 256>}, {pipeline_mode = #tpu.pipeline_mode<synchronous>, transform_indices = @transform_8, window_bounds = array<i64: 1, 256>}, {pipeline_mode = #tpu.pipeline_mode<synchronous>, transform_indices = @transform_9, window_bounds = array<i64: 256, 128>}, {pipeline_mode = #tpu.pipeline_mode<synchronous>, transform_indices = @transform_10, window_bounds = array<i64: 1, 128>}, {transform_indices = @transform_11, window_bounds = array<i64: 1, 8, 128>}]} {
    %c0 = arith.constant 0 : index
    %c0_0 = arith.constant 0 : index
    %c0_1 = arith.constant 0 : index
    %0 = vector.load %arg1[%c0, %c0_0, %c0_1] : memref<1x8x128xf32, #tpu.memory_space<vmem>>, vector<1x8x128xf32>
    %1 = vector.shape_cast %0 : vector<1x8x128xf32> to vector<8x128xf32>
    %2 = arith.truncf %1 : vector<8x128xf32> to vector<8x128xbf16>
    %c0_2 = arith.constant 0 : index
    %c0_3 = arith.constant 0 : index
    %3 = vector.load %arg3[%c0_2, %c0_3] : memref<128x384xbf16, #tpu.memory_space<vmem>>, vector<128x384xbf16>
    %cst = arith.constant dense<0.000000e+00> : vector<8x384xf32>
    %4 = tpu.matmul %2, %3, %cst {dimension_numbers = #tpu.dot_dimension_numbers<[1], [0], [0], [1], [0, 0, 1, 1], [], []>} : vector<8x128xbf16>, vector<128x384xbf16>, vector<8x384xf32> -> vector<8x384xf32>
    %c0_4 = arith.constant 0 : index
    %c0_5 = arith.constant 0 : index
    %5 = vector.load %arg4[%c0_4, %c0_5] : memref<1x384xf32, #tpu.memory_space<vmem>>, vector<1x384xf32>
    %6 = vector.broadcast %5 : vector<1x384xf32> to vector<8x384xf32>
    %7 = arith.addf %4, %6 : vector<8x384xf32>
    %8 = vector.extract_strided_slice %7 {offsets = [0, 0], sizes = [8, 128], strides = [1, 1]} : vector<8x384xf32> to vector<8x128xf32>
    %9 = vector.shape_cast %8 : vector<8x128xf32> to vector<1x8x128xf32>
    %10 = vector.extract_strided_slice %7 {offsets = [0, 128], sizes = [8, 128], strides = [1, 1]} : vector<8x384xf32> to vector<8x128xf32>
    %11 = vector.shape_cast %10 : vector<8x128xf32> to vector<1x8x128xf32>
    %12 = vector.extract_strided_slice %7 {offsets = [0, 256], sizes = [8, 128], strides = [1, 1]} : vector<8x384xf32> to vector<8x128xf32>
    %13 = vector.shape_cast %12 : vector<8x128xf32> to vector<1x8x128xf32>
    %14 = arith.truncf %9 : vector<1x8x128xf32> to vector<1x8x128xbf16>
    %15 = arith.truncf %11 : vector<1x8x128xf32> to vector<1x8x128xbf16>
    "tpu.trace_start"() <{level = 10 : i32, message = "bqd,bkd->bqk"}> : () -> ()
    %cst_6 = arith.constant dense<0.000000e+00> : vector<1x8x8xf32>
    %16 = tpu.matmul %14, %15, %cst_6 {dimension_numbers = #tpu.dot_dimension_numbers<[2], [2], [1], [1], [0, 0, 0, 1, 1, 1], [0], [0]>} : vector<1x8x128xbf16>, vector<1x8x128xbf16>, vector<1x8x8xf32> -> vector<1x8x8xf32>
    %cst_7 = arith.constant 1.280000e+02 : f32
    "tpu.trace_stop"() : () -> ()
    %17 = math.sqrt %cst_7 : f32
    %cst_8 = arith.constant 1.000000e+00 : f32
    %18 = arith.divf %cst_8, %17 : f32
    %19 = vector.broadcast %18 : f32 to vector<1x8x8xf32>
    %20 = arith.mulf %16, %19 : vector<1x8x8xf32>
    %21 = tpu.iota {dimensions = array<i32: 2>} : vector<1x1x8xi32>
    %c0_9 = arith.constant 0 : index
    %c0_10 = arith.constant 0 : index
    %c0_11 = arith.constant 0 : index
    %22 = vector.load %arg2[%c0_9, %c0_10, %c0_11] : memref<1x1x1xi32, #tpu.memory_space<vmem>>, vector<1x1x1xi32>
    %23 = vector.broadcast %22 : vector<1x1x1xi32> to vector<1x1x8xi32>
    %24 = arith.cmpi slt, %21, %23 : vector<1x1x8xi32>
    %cst_12 = arith.constant 0.000000e+00 : f32
    %cst_13 = arith.constant -1.000000e+09 : f32
    %25 = vector.broadcast %cst_12 : f32 to vector<1x1x8xf32>
    %26 = vector.broadcast %cst_13 : f32 to vector<1x1x8xf32>
    %27 = arith.select %24, %25, %26 : vector<1x1x8xi1>, vector<1x1x8xf32>
    %28 = vector.broadcast %27 : vector<1x1x8xf32> to vector<1x8x8xf32>
    %29 = arith.addf %20, %28 : vector<1x8x8xf32>
    %cst_14 = arith.constant dense<0xFF800000> : vector<1x8xf32>
    %30 = vector.multi_reduction <maximumf>, %29, %cst_14 [2] : vector<1x8x8xf32> to vector<1x8xf32>
    %31 = vector.shape_cast %30 : vector<1x8xf32> to vector<1x8x1xf32>
    %32 = vector.broadcast %31 : vector<1x8x1xf32> to vector<1x8x8xf32>
    %33 = arith.subf %29, %32 : vector<1x8x8xf32>
    %34 = math.exp %33 : vector<1x8x8xf32>
    %cst_15 = arith.constant dense<0.000000e+00> : vector<1x8xf32>
    %35 = vector.multi_reduction <add>, %34, %cst_15 [2] : vector<1x8x8xf32> to vector<1x8xf32>
    %36 = vector.shape_cast %35 : vector<1x8xf32> to vector<1x8x1xf32>
    %37 = tpu.reciprocal %36 {approx = true} : vector<1x8x1xf32> -> vector<1x8x1xf32>
    %38 = vector.broadcast %37 : vector<1x8x1xf32> to vector<1x8x8xf32>
    %39 = arith.mulf %34, %38 : vector<1x8x8xf32>
    %40 = arith.truncf %39 : vector<1x8x8xf32> to vector<1x8x8xbf16>
    %41 = arith.truncf %13 : vector<1x8x128xf32> to vector<1x8x128xbf16>
    "tpu.trace_start"() <{level = 10 : i32, message = "bqk,bkd->bqd"}> : () -> ()
    %cst_16 = arith.constant dense<0.000000e+00> : vector<1x8x128xf32>
    %42 = tpu.matmul %40, %41, %cst_16 {dimension_numbers = #tpu.dot_dimension_numbers<[2], [1], [1], [2], [0, 0, 0, 1, 1, 2], [0], [0]>} : vector<1x8x8xbf16>, vector<1x8x128xbf16>, vector<1x8x128xf32> -> vector<1x8x128xf32>
    "tpu.trace_stop"() : () -> ()
    %43 = vector.shape_cast %42 : vector<1x8x128xf32> to vector<8x128xf32>
    %44 = arith.truncf %43 : vector<8x128xf32> to vector<8x128xbf16>
    %c0_17 = arith.constant 0 : index
    %c0_18 = arith.constant 0 : index
    %45 = vector.load %arg5[%c0_17, %c0_18] : memref<128x128xbf16, #tpu.memory_space<vmem>>, vector<128x128xbf16>
    %cst_19 = arith.constant dense<0.000000e+00> : vector<8x128xf32>
    %46 = tpu.matmul %44, %45, %cst_19 {dimension_numbers = #tpu.dot_dimension_numbers<[1], [0], [0], [1], [0, 0, 1, 1], [], []>} : vector<8x128xbf16>, vector<128x128xbf16>, vector<8x128xf32> -> vector<8x128xf32>
    %c0_20 = arith.constant 0 : index
    %c0_21 = arith.constant 0 : index
    %47 = vector.load %arg6[%c0_20, %c0_21] : memref<1x128xf32, #tpu.memory_space<vmem>>, vector<1x128xf32>
    %48 = vector.broadcast %47 : vector<1x128xf32> to vector<8x128xf32>
    %49 = arith.addf %46, %48 : vector<8x128xf32>
    %50 = arith.addf %1, %49 : vector<8x128xf32>
    %c0_22 = arith.constant 0 : index
    %c0_23 = arith.constant 0 : index
    %c0_24 = arith.constant 0 : index
    %51 = vector.load %arg7[%c0_22, %c0_23, %c0_24] : memref<4x1x128xf32, #tpu.memory_space<vmem>>, vector<1x1x128xf32>
    %52 = vector.shape_cast %51 : vector<1x1x128xf32> to vector<1x128xf32>
    %c1 = arith.constant 1 : index
    %c0_25 = arith.constant 0 : index
    %c0_26 = arith.constant 0 : index
    %53 = vector.load %arg7[%c1, %c0_25, %c0_26] : memref<4x1x128xf32, #tpu.memory_space<vmem>>, vector<1x1x128xf32>
    %54 = vector.shape_cast %53 : vector<1x1x128xf32> to vector<1x128xf32>
    %cst_27 = arith.constant dense<0.000000e+00> : vector<8xf32>
    %55 = vector.multi_reduction <add>, %50, %cst_27 [1] : vector<8x128xf32> to vector<8xf32>
    %56 = vector.shape_cast %55 : vector<8xf32> to vector<8x1xf32>
    %cst_28 = arith.constant 1.280000e+02 : f32
    %57 = vector.broadcast %cst_28 : f32 to vector<8x1xf32>
    %58 = arith.divf %56, %57 : vector<8x1xf32>
    %59 = vector.broadcast %58 : vector<8x1xf32> to vector<8x128xf32>
    %60 = arith.subf %50, %59 : vector<8x128xf32>
    %61 = arith.mulf %60, %60 : vector<8x128xf32>
    %cst_29 = arith.constant dense<0.000000e+00> : vector<8xf32>
    %62 = vector.multi_reduction <add>, %61, %cst_29 [1] : vector<8x128xf32> to vector<8xf32>
    %63 = vector.shape_cast %62 : vector<8xf32> to vector<8x1xf32>
    %cst_30 = arith.constant 1.280000e+02 : f32
    %64 = vector.broadcast %cst_30 : f32 to vector<8x1xf32>
    %65 = arith.divf %63, %64 : vector<8x1xf32>
    %66 = vector.broadcast %58 : vector<8x1xf32> to vector<8x128xf32>
    %67 = arith.subf %50, %66 : vector<8x128xf32>
    %cst_31 = arith.constant 9.99999996E-13 : f32
    %68 = vector.broadcast %cst_31 : f32 to vector<8x1xf32>
    %69 = arith.addf %65, %68 : vector<8x1xf32>
    %70 = math.rsqrt %69 : vector<8x1xf32>
    %71 = vector.broadcast %70 : vector<8x1xf32> to vector<8x128xf32>
    %72 = arith.mulf %67, %71 : vector<8x128xf32>
    %73 = vector.broadcast %52 : vector<1x128xf32> to vector<8x128xf32>
    %74 = arith.mulf %72, %73 : vector<8x128xf32>
    %75 = vector.broadcast %54 : vector<1x128xf32> to vector<8x128xf32>
    %76 = arith.addf %74, %75 : vector<8x128xf32>
    %77 = arith.truncf %76 : vector<8x128xf32> to vector<8x128xbf16>
    %c0_32 = arith.constant 0 : index
    %c0_33 = arith.constant 0 : index
    %78 = vector.load %arg8[%c0_32, %c0_33] : memref<128x256xbf16, #tpu.memory_space<vmem>>, vector<128x256xbf16>
    %cst_34 = arith.constant dense<0.000000e+00> : vector<8x256xf32>
    %79 = tpu.matmul %77, %78, %cst_34 {dimension_numbers = #tpu.dot_dimension_numbers<[1], [0], [0], [1], [0, 0, 1, 1], [], []>} : vector<8x128xbf16>, vector<128x256xbf16>, vector<8x256xf32> -> vector<8x256xf32>
    %c0_35 = arith.constant 0 : index
    %c0_36 = arith.constant 0 : index
    %80 = vector.load %arg9[%c0_35, %c0_36] : memref<1x256xf32, #tpu.memory_space<vmem>>, vector<1x256xf32>
    %81 = vector.broadcast %80 : vector<1x256xf32> to vector<8x256xf32>
    %82 = arith.addf %79, %81 : vector<8x256xf32>
    %cst_37 = arith.constant 5.000000e-01 : f32
    %83 = vector.broadcast %cst_37 : f32 to vector<8x256xf32>
    %84 = arith.mulf %83, %82 : vector<8x256xf32>
    %cst_38 = arith.constant 4.471500e-02 : f32
    %85 = vector.broadcast %cst_38 : f32 to vector<8x256xf32>
    %86 = arith.mulf %85, %82 : vector<8x256xf32>
    %87 = arith.mulf %86, %82 : vector<8x256xf32>
    %88 = arith.mulf %87, %82 : vector<8x256xf32>
    %89 = arith.addf %82, %88 : vector<8x256xf32>
    %cst_39 = arith.constant 0.797884583 : f32
    %90 = vector.broadcast %cst_39 : f32 to vector<8x256xf32>
    %91 = arith.mulf %90, %89 : vector<8x256xf32>
    %92 = math.tanh %91 : vector<8x256xf32>
    %cst_40 = arith.constant 1.000000e+00 : f32
    %93 = vector.broadcast %cst_40 : f32 to vector<8x256xf32>
    %94 = arith.addf %93, %92 : vector<8x256xf32>
    %95 = arith.mulf %84, %94 : vector<8x256xf32>
    %96 = arith.truncf %95 : vector<8x256xf32> to vector<8x256xbf16>
    %c0_41 = arith.constant 0 : index
    %c0_42 = arith.constant 0 : index
    %97 = vector.load %arg10[%c0_41, %c0_42] : memref<256x128xbf16, #tpu.memory_space<vmem>>, vector<256x128xbf16>
    %cst_43 = arith.constant dense<0.000000e+00> : vector<8x128xf32>
    %98 = tpu.matmul %96, %97, %cst_43 {dimension_numbers = #tpu.dot_dimension_numbers<[1], [0], [0], [1], [0, 0, 1, 1], [], []>} : vector<8x256xbf16>, vector<256x128xbf16>, vector<8x128xf32> -> vector<8x128xf32>
    %c0_44 = arith.constant 0 : index
    %c0_45 = arith.constant 0 : index
    %99 = vector.load %arg11[%c0_44, %c0_45] : memref<1x128xf32, #tpu.memory_space<vmem>>, vector<1x128xf32>
    %100 = vector.broadcast %99 : vector<1x128xf32> to vector<8x128xf32>
    %101 = arith.addf %98, %100 : vector<8x128xf32>
    %102 = arith.addf %76, %101 : vector<8x128xf32>
    %c2 = arith.constant 2 : index
    %c0_46 = arith.constant 0 : index
    %c0_47 = arith.constant 0 : index
    %103 = vector.load %arg7[%c2, %c0_46, %c0_47] : memref<4x1x128xf32, #tpu.memory_space<vmem>>, vector<1x1x128xf32>
    %104 = vector.shape_cast %103 : vector<1x1x128xf32> to vector<1x128xf32>
    %c3 = arith.constant 3 : index
    %c0_48 = arith.constant 0 : index
    %c0_49 = arith.constant 0 : index
    %105 = vector.load %arg7[%c3, %c0_48, %c0_49] : memref<4x1x128xf32, #tpu.memory_space<vmem>>, vector<1x1x128xf32>
    %106 = vector.shape_cast %105 : vector<1x1x128xf32> to vector<1x128xf32>
    %cst_50 = arith.constant dense<0.000000e+00> : vector<8xf32>
    %107 = vector.multi_reduction <add>, %102, %cst_50 [1] : vector<8x128xf32> to vector<8xf32>
    %108 = vector.shape_cast %107 : vector<8xf32> to vector<8x1xf32>
    %cst_51 = arith.constant 1.280000e+02 : f32
    %109 = vector.broadcast %cst_51 : f32 to vector<8x1xf32>
    %110 = arith.divf %108, %109 : vector<8x1xf32>
    %111 = vector.broadcast %110 : vector<8x1xf32> to vector<8x128xf32>
    %112 = arith.subf %102, %111 : vector<8x128xf32>
    %113 = arith.mulf %112, %112 : vector<8x128xf32>
    %cst_52 = arith.constant dense<0.000000e+00> : vector<8xf32>
    %114 = vector.multi_reduction <add>, %113, %cst_52 [1] : vector<8x128xf32> to vector<8xf32>
    %115 = vector.shape_cast %114 : vector<8xf32> to vector<8x1xf32>
    %cst_53 = arith.constant 1.280000e+02 : f32
    %116 = vector.broadcast %cst_53 : f32 to vector<8x1xf32>
    %117 = arith.divf %115, %116 : vector<8x1xf32>
    %118 = vector.broadcast %110 : vector<8x1xf32> to vector<8x128xf32>
    %119 = arith.subf %102, %118 : vector<8x128xf32>
    %cst_54 = arith.constant 9.99999996E-13 : f32
    %120 = vector.broadcast %cst_54 : f32 to vector<8x1xf32>
    %121 = arith.addf %117, %120 : vector<8x1xf32>
    %122 = math.rsqrt %121 : vector<8x1xf32>
    %123 = vector.broadcast %122 : vector<8x1xf32> to vector<8x128xf32>
    %124 = arith.mulf %119, %123 : vector<8x128xf32>
    %125 = vector.broadcast %104 : vector<1x128xf32> to vector<8x128xf32>
    %126 = arith.mulf %124, %125 : vector<8x128xf32>
    %127 = vector.broadcast %106 : vector<1x128xf32> to vector<8x128xf32>
    %128 = arith.addf %126, %127 : vector<8x128xf32>
    %129 = vector.shape_cast %128 : vector<8x128xf32> to vector<1x8x128xf32>
    %c0_55 = arith.constant 0 : index
    %c0_56 = arith.constant 0 : index
    %c0_57 = arith.constant 0 : index
    %130 = vector.load %arg12[%c0_55, %c0_56, %c0_57] : memref<1x8x128xf32, #tpu.memory_space<vmem>>, vector<1x8x128xf32>
    tpu.vector_store %arg12[%c0_55, %c0_56, %c0_57], %129 {strides = array<i32>} : memref<1x8x128xf32, #tpu.memory_space<vmem>>, vector<1x8x128xf32>,
    return
  }
  func.func @transform_0(%arg0: i32) -> (i32, i32, i32) {
    %c0_i32 = arith.constant 0 : i32
    %c0_i32_0 = arith.constant 0 : i32
    %c0_i32_1 = arith.constant 0 : i32
    return %arg0, %c0_i32, %c0_i32_0 : i32, i32, i32
  }
  func.func @transform_1(%arg0: i32) -> (i32, i32, i32) {
    %c0_i32 = arith.constant 0 : i32
    %c0_i32_0 = arith.constant 0 : i32
    %c0_i32_1 = arith.constant 0 : i32
    return %arg0, %c0_i32, %c0_i32_0 : i32, i32, i32
  }
  func.func @transform_2(%arg0: i32) -> (i32, i32) {
    %c0_i32 = arith.constant 0 : i32
    %c0_i32_0 = arith.constant 0 : i32
    %c0_i32_1 = arith.constant 0 : i32
    return %c0_i32, %c0_i32_0 : i32, i32
  }
  func.func @transform_3(%arg0: i32) -> (i32, i32) {
    %c0_i32 = arith.constant 0 : i32
    %c0_i32_0 = arith.constant 0 : i32
    %c0_i32_1 = arith.constant 0 : i32
    return %c0_i32, %c0_i32_0 : i32, i32
  }
  func.func @transform_4(%arg0: i32) -> (i32, i32) {
    %c0_i32 = arith.constant 0 : i32
    %c0_i32_0 = arith.constant 0 : i32
    %c0_i32_1 = arith.constant 0 : i32
    return %c0_i32, %c0_i32_0 : i32, i32
  }
  func.func @transform_5(%arg0: i32) -> (i32, i32) {
    %c0_i32 = arith.constant 0 : i32
    %c0_i32_0 = arith.constant 0 : i32
    %c0_i32_1 = arith.constant 0 : i32
    return %c0_i32, %c0_i32_0 : i32, i32
  }
  func.func @transform_6(%arg0: i32) -> (i32, i32, i32) {
    %c0_i32 = arith.constant 0 : i32
    %c0_i32_0 = arith.constant 0 : i32
    %c0_i32_1 = arith.constant 0 : i32
    %c0_i32_2 = arith.constant 0 : i32
    return %c0_i32, %c0_i32_0, %c0_i32_1 : i32, i32, i32
  }
  func.func @transform_7(%arg0: i32) -> (i32, i32) {
    %c0_i32 = arith.constant 0 : i32
    %c0_i32_0 = arith.constant 0 : i32
    %c0_i32_1 = arith.constant 0 : i32
    return %c0_i32, %c0_i32_0 : i32, i32
  }
  func.func @transform_8(%arg0: i32) -> (i32, i32) {
    %c0_i32 = arith.constant 0 : i32
    %c0_i32_0 = arith.constant 0 : i32
    %c0_i32_1 = arith.constant 0 : i32
    return %c0_i32, %c0_i32_0 : i32, i32
  }
  func.func @transform_9(%arg0: i32) -> (i32, i32) {
    %c0_i32 = arith.constant 0 : i32
    %c0_i32_0 = arith.constant 0 : i32
    %c0_i32_1 = arith.constant 0 : i32
    return %c0_i32, %c0_i32_0 : i32, i32
  }
  func.func @transform_10(%arg0: i32) -> (i32, i32) {
    %c0_i32 = arith.constant 0 : i32
    %c0_i32_0 = arith.constant 0 : i32
    %c0_i32_1 = arith.constant 0 : i32
    return %c0_i32, %c0_i32_0 : i32, i32
  }
  func.func @transform_11(%arg0: i32) -> (i32, i32, i32) {
    %c0_i32 = arith.constant 0 : i32
    %c0_i32_0 = arith.constant 0 : i32
    %c0_i32_1 = arith.constant 0 : i32
    return %arg0, %c0_i32, %c0_i32_0 : i32, i32, i32
  }
}

</mosaic_0001>

<bundles_post_ra>
// kernel: tpu_custom_call.1
= control target key start
LH: loop header
LB: loop body
LE: loop exit
PB: predicated region body
PF: predicated region fallthrough
CT: control target
= control target key end

     0   :  { %s2454_s0 = inlined_call_operand.hbm [shape: f32[2,8,128], index: 0, kind: input, shape index: {}]   ;;  %s2455_s1 = inlined_call_operand.vmem [shape: s32[2,1,1], index: 1, kind: input, shape index: {}]   ;;  %s2456_s2 = inlined_call_operand.hbm [shape: bf16[128,384], index: 2, kind: input, shape index: {}]   ;;  %s2457_s3 = inlined_call_operand.vmem [shape: f32[1,384], index: 3, kind: input, shape index: {}]   ;;  %s2458_s4 = inlined_call_operand.hbm [shape: bf16[128,128], index: 4, kind: input, shape index: {}]   ;;  %s2459_s5 = inlined_call_operand.vmem [shape: f32[1,128], index: 5, kind: input, shape index: {}]   ;;  %s2460_s6 = inlined_call_operand.vmem [shape: f32[4,1,128], index: 6, kind: input, shape index: {}]   ;;  %s2461_s7 = inlined_call_operand.hbm [shape: bf16[128,256], index: 7, kind: input, shape index: {}]   ;;  %s2462_s8 = inlined_call_operand.vmem [shape: f32[1,256], index: 8, kind: input, shape index: {}]   ;;  %s2463_s9 = inlined_call_operand.hbm [shape: bf16[256,128], index: 9, kind: input, shape index: {}]   ;;  %s2464_s10 = inlined_call_operand.vmem [shape: f32[1,128], index: 10, kind: input, shape index: {}]   ;;  %s2465_s11 = inlined_call_operand.hbm [shape: f32[2,8,128], index: 11, kind: output, shape index: {}]  }
   0x1   :  { %2471 = sst [smem:[#allocation18_spill]] %s2456_s2 }
   0x2   :  { %2472 = sst [smem:[#allocation19_spill]] %s2458_s4 }
   0x3   :  { %2473 = sst [smem:[#allocation20_spill]] %s2461_s7 }
   0x4   :  { %2474 = sst [smem:[#allocation21_spill]] %s2463_s9 }
   0x5   :  { %16 = vsyncpa [#allocation3], 0 }
   0x6   :  { %18 = vsyncpa [#allocation3 + $0x1], 0 }
   0x7   :  { %19 = vsyncpa [#allocation6], 0 }
   0x8   :  { %20 = vsyncpa [#allocation9], 0 }
   0x9   :  { %21 = vsyncpa [#allocation4], 0 }
   0xa   :  { %23 = vsyncpa [#allocation4 + $0x1], 0  ;;  %s2163_s17 = smov 0   ;;  %s2165_s18 = smov 0  }
   0xb   :  { %s2167_s19 = smov 0   ;;  %s2169_s20 = smov 0  }
   0xc LB: > { %2475 = sst [smem:[#allocation16_spill]] %s2081_s19  ;;  %s2087_s21 = smov [#allocation5]   ;;  %s2085_s20 = sphi %s2169_s20, %s2501_s20   ;;  %s2081_s19 = sphi %s2167_s19, %s2498_s19   ;;  %s2077_s18 = sphi %s2165_s18, %s2500_s18   ;;  %s2073_s17 = sphi %s2163_s17, %s2499_s17  }
   0xd   : > { %s313_s22 = sshll.u32 %s2087_s21, 4  ;;  %s2184_s23 = sadd.s32 4294967295, %s2085_s20   ;;  %s314_s22 = int_to_ptr.vmem [resolvable:$true] %s313_s22 }
   0xe   : > { %p1502_p0 = scmp.ge.s32.totalorder %s2085_s20, 1  ;;  %p2466_p1 = scmp.eq.s32.totalorder %s2184_s23, 0 }
   0xf   : > { %p301_p2 = scmp.lt.s32.totalorder %s2085_s20, 3  ;;  %s2088_s25 = smov [#allocation8]  }
  0x10   : > { %s348_s26 = sshll.u32 %s2088_s25, 4  ;;  %s2089_s28 = smov [#allocation7]   ;;  %s2202_s26 = int_to_ptr.vmem [resolvable:$true] %s348_s26 }
  0x11   : > { %p2189_p3 = pnand %p1502_p0, %p301_p2  ;;  %s2204_s29 = sshll.u32 %s2089_s28, 4  ;;  %s330_s29 = int_to_ptr.vmem [resolvable:$true] %s2204_s29 }
  0x12   : > { %s1892_s30 = scalar_lea.vmem %s314_s22, 3072  ;;  %p1900_p11 = scmp.lt.s32.totalorder %s314_s22, %s314_s22 }
  0x13   : > { %s2476_s24 = scalar_select %p2189_p3, 1, 0 }
  0x14   : > { %p1711_p5 = pneg %p2189_p3  ;;  %p1893_p8 = scmp.ne.s32.totalorder %s314_s22, %s1892_s30 }
  0x15   : > { %p1901_p12 = scmp.lt.s32.totalorder %s1892_s30, %s1892_s30 }
  0x16   : > { %p2198_p6 = pnand %p1711_p5, %p2466_p1 }
  0x17   : > { %p1902_p13 = por %p1901_p12, %p1900_p11 }
  0x18   : > { %p1883_p7 = pneg %p2198_p6 }
  0x1a   : > { %p1895_p9 = pnand %p1893_p8, %p1883_p7 }
  0x1c   : > { %p1896_p10 = pneg %p1895_p9 }
  0x1e   : > { %p1903_p0 = pnand %p1902_p13, %p1896_p10 }
  0x20   : > { %1906 = shalt.err (!%p1903_p0)
}
  0x21   : > { %s2090_s12 = smov 192   ;;  %s2091_s13 = smov 12  }
  0x22   : > { %s2478_s2 = sld [smem:[#allocation18_spill]]  ;;  %s1918_s16 = scalar_lea.vmem %s2202_s26, 2048 }
  0x23   : > { %p1919_p2 = scmp.ne.s32.totalorder %s2202_s26, %s1918_s16  ;;  %p1926_p9 = scmp.lt.s32.totalorder %s2202_s26, %s2202_s26 }
  0x24   : > { %p1927_p10 = scmp.lt.s32.totalorder %s1918_s16, %s1918_s16 }
  0x25   : > { %p1921_p5 = pnand %p1919_p2, %p1883_p7 }
  0x26   : > { %p1928_p11 = por %p1927_p10, %p1926_p9 }
  0x27   : > { %p1922_p8 = pneg %p1921_p5 }
  0x28   : > { %1714 = dma.hbm_to_vmem [thread:$0]  (!%p2198_p6), %s2478_s2, 3072, %s314_s22, [#allocation6], %s2090_s12, %s2090_s12, %s2091_s13  }
  0x29   : > { %p1929_p12 = pnand %p1928_p11, %p1922_p8 }
  0x2b   : > { %1932 = shalt.err (!%p1929_p12)
}
  0x2c   : > { %s2092_s21 = smov 128   ;;  %s2093_s25 = smov 8  }
  0x2d   : > { %s2479_s7 = sld [smem:[#allocation20_spill]]  ;;  %s1944_s30 = scalar_lea.vmem %s330_s29, 1024 }
  0x2e   : > { %p1945_p13 = scmp.ne.s32.totalorder %s330_s29, %s1944_s30  ;;  %p1952_p5 = scmp.lt.s32.totalorder %s330_s29, %s330_s29 }
  0x2f   : > { %p1953_p8 = scmp.lt.s32.totalorder %s1944_s30, %s1944_s30 }
  0x30   : > { %p1947_p0 = pnand %p1945_p13, %p1883_p7 }
  0x31   : > { %p1954_p9 = por %p1953_p8, %p1952_p5 }
  0x32   : > { %p1948_p2 = pneg %p1947_p0 }
  0x33   : > { %1720 = dma.hbm_to_vmem [thread:$0]  (!%p2198_p6), %s2479_s7, 2048, %s2202_s26, [#allocation9], %s2092_s21, %s2092_s21, %s2093_s25  }
  0x34   : > { %p1955_p10 = pnand %p1954_p9, %p1948_p2 }
  0x36   : > { %1958 = shalt.err (!%p1955_p10)
}
  0x37   : > { %s2094_s12 = smov 64   ;;  %s2095_s13 = smov 4  }
  0x38   : > { %s2480_s4 = sld [smem:[#allocation19_spill]]  ;;  %s2096_s26 = smov [#allocation10]  }
  0x39   : > { %s364_s16 = sshll.u32 %s2096_s26, 4  ;;  %s365_s16 = int_to_ptr.vmem [resolvable:$true] %s364_s16 }
  0x3a   : > { %s1970_s21 = scalar_lea.vmem %s365_s16, 2048  ;;  %p1978_p0 = scmp.lt.s32.totalorder %s365_s16, %s365_s16 }
  0x3b   : > { %p1971_p11 = scmp.ne.s32.totalorder %s365_s16, %s1970_s21  ;;  %p1979_p2 = scmp.lt.s32.totalorder %s1970_s21, %s1970_s21 }
  0x3d   : > { %p1973_p12 = pnand %p1971_p11, %p1883_p7  ;;  %p1980_p5 = por %p1979_p2, %p1978_p0 }
  0x3e   : > { %1717 = dma.hbm_to_vmem [thread:$0]  (!%p2198_p6), %s2480_s4, 1024, %s330_s29, [#allocation6], %s2094_s12, %s2094_s12, %s2095_s13  }
  0x3f   : > { %p1974_p13 = pneg %p1973_p12 }
  0x41   : > { %p1981_p8 = pnand %p1980_p5, %p1974_p13 }
  0x43   : > { %1984 = shalt.err (!%p1981_p8)
}
  0x44   : > { %s2481_s9 = sld [smem:[#allocation21_spill]]  ;;  %s1501_s29 = sadd.s32 4294967294, %s2085_s20  }
  0x45   : > { %s2248_s27 = sadd.s32 1, %s2085_s20   ;;  %s36_s30 = sadd.s32 1, %s2081_s19 }
  0x46   : > { %s33_s28 = ssub.s32 %s2085_s20, %s2248_s27  ;;  %p43_p9 = scmp.ne.s32.totalorder %s2081_s19, %s2077_s18 }
  0x47   : > { %p34_p7 = scmp.eq.s32.totalorder %s33_s28, 0  ;;  %p44_p10 = scmp.eq.s32.totalorder %s2085_s20, 0 }
  0x48   : > { %p49_p11 = scmp.ne.s32.totalorder %s2077_s18, %s2073_s17  ;;  %p288_p13 = scmp.eq.s32.totalorder %s2184_s23, 1 }
  0x49   : > { %s2259_s14 = scalar_select %p34_p7, %s2081_s19, %s36_s30  }
  0x4a   : > { %1723 = dma.hbm_to_vmem [thread:$0]  (!%p2198_p6), %s2481_s9, 2048, %s365_s16, [#allocation9], %s2094_s12, %s2094_s12, %s2095_s13  }
  0x4b   : > { %2482 = sst [smem:[#allocation17_spill]] %s2259_s14  ;;  %p2261_p12 = por %p44_p10, %p43_p9 }
  0x4c   : > { %p2267_p6 = por %p2466_p1, %p49_p11  ;;  %p294_p0 = scmp.eq.s32.totalorder %s1501_s29, 1 }
  0x4d   : > { %p1736_p2 = scmp.lt.s32.totalorder %s2085_s20, 2  ;;  %s381_s13 = sand.u32 1, %s2081_s19  }
  0x4e   : > { %s2484_s12 = scalar_select %p2267_p6, 1, 0 }
  0x4f   : > { %p2274_p5 = por %p288_p13, %p43_p9  ;;  %p2278_p8 = por %p294_p0, %p49_p11 }
  0x50   : > { %s1508_s21 = sshll.u32 %s381_s13, 3  ;;  %s1509_s25 = sshll.u32 %s2085_s20, 7 }
  0x51   : > { %s2485_s26 = scalar_select %p2274_p5, 1, 0 }
  0x52   : > { %s2486_s16 = scalar_select %p2278_p8, 1, 0 }
  0x53   : > { %s2286_s30 = scalar_lea.hbm %s2454_s0, %s1509_s25  ;;  %s385_s29 = scalar_lea.vmem [#allocation2], %s1508_s21 }
  0x54   : > { %s392_s2 = sshll.u32 %s385_s29, 4  ;;  %p2290_p7 = pnand %p1736_p2, %p2261_p12  ;;  %s393_s2 = int_to_ptr.vmem [resolvable:$true] %s392_s2 }
  0x55   : > { %s382_s7 = scalar_lea.sflag [#allocation3], %s381_s13  ;;  %s1985_s9 = scalar_lea.hbm %s2286_s30, 128 }
  0x56   : > { %p1986_p9 = scmp.ne.s32.totalorder %s2286_s30, %s1985_s9  ;;  %p1987_p10 = pneg %p2290_p7 }
  0x57   : > { %s1990_s28 = scalar_lea.hbm %s2454_s0, 256  ;;  %p1991_p0 = scmp.lt.s32.totalorder %s2286_s30, %s2454_s0 }
  0x58   : > { %p1988_p11 = pnand %p1987_p10, %p1986_p9  ;;  %p1992_p12 = scmp.lt.s32.totalorder %s1990_s28, %s1985_s9 }
  0x5a   : > { %p1989_p13 = pneg %p1988_p11  ;;  %p1993_p2 = por %p1992_p12, %p1991_p0 }
  0x5c   : > { %p1994_p4 = pnand %p1993_p2, %p1989_p13 }
  0x5e   : > { %1997 = shalt.err (!%p1994_p4)
}
  0x5f   : > { %s1998_s15 = scalar_lea.vmem %s393_s2, 128  ;;  %s2097_s13 = smov [#allocation2]  }
  0x60   : > { %p1999_p1 = scmp.ne.s32.totalorder %s393_s2, %s1998_s15  ;;  %s2003_s14 = sshll.u32 %s2097_s13, 4  ;;  %s2004_s14 = int_to_ptr.vmem [resolvable:$false] %s2003_s14 }
  0x61   : > { %s2005_s19 = scalar_lea.vmem %s2004_s14, 256  ;;  %p2006_p9 = scmp.lt.s32.totalorder %s393_s2, %s2004_s14 }
  0x62   : > { %p2001_p8 = pnand %p1999_p1, %p1987_p10  ;;  %p2007_p11 = scmp.lt.s32.totalorder %s2005_s19, %s1998_s15 }
  0x64   : > { %p2002_p5 = pneg %p2001_p8  ;;  %p2008_p6 = por %p2007_p11, %p2006_p9 }
  0x66   : > { %p2009_p3 = pnand %p2008_p6, %p2002_p5 }
  0x68   : > { %2012 = shalt.err (!%p2009_p3)
}
  0x69   : > { %1727 = dma.hbm_to_vmem [thread:$0]  (!%p2290_p7), %s2286_s30, 128, %s393_s2, %s382_s7  }
  0x6a   : > { %p2488_p13 = scmp.ne.s32.totalorder %s2476_s24, 0 }
  0x6b   : > { %s2311_s9 = sand.u32 (!%p2488_p13), 1, %s2077_s18   ;;  %p2489_p1 = scmp.ne.s32.totalorder (!%p2488_p13), %s2484_s12, 0 }
  0x6c   : > { %407 = sbr.rel (%p2488_p13) target bundleno = 2319 (0x90f), region = 64  ;;  %s1511_s25 = sshll.u32 (!%p2488_p13), %s2311_s9, 3 }
  0x6d   : > { %s410_s14 = scalar_lea.sflag (!%p2488_p13), [#allocation3], %s2311_s9  ;;  %s2317_s19 = scalar_lea.vmem (!%p2488_p13), [#allocation2], %s1511_s25 }
  0x71   : > { %2056 = dma.done.wait (%p2489_p1), %s410_s14, 128  }
  0x72   : > { %2058 = vsyncadd (%p2489_p1), %s410_s14, 4294967168  ;;  %p2490_p3 = scmp.eq.s32.totalorder %s2184_s23, 0 }
  0x74   : > { %2060 = dma.done.wait (%p2490_p3), [#allocation6], 4096   ;;  %p2491_p4 = pmov %p2490_p3 }
  0x75   : > { %p2492_p6 = pmov %p2490_p3 }
  0x76   : > { %2062 = vsyncadd (%p2491_p4), [#allocation6], 4294963200 }
  0x77   : > { %2064 = dma.done.wait (%p2492_p6), [#allocation9], 4096   ;;  %p2493_p5 = pmov %p2490_p3 }
  0x78   : > { %v2098_v0 = vmov 0   ;;  %v2099_v1 = vmov 0.0   ;;  %v1789_v2 = vld [vmem:[#allocation5 + $0xac] ss:$12 sps:$4 sm:$0xff]   ;;  %v1791_v3 = vld [vmem:[#allocation5 + $0xa8] ss:$12 sps:$4 sm:$0xff]   ;;  %v511_v29 = vlaneseq }
  0x79   : > { %2066 = vsyncadd (%p2493_p5), [#allocation9], 4294963200  ;;  %686 = vmatprep.mubr.bf16.mxu0 %v2098_v0  ;;  %1639 = vmatprep.subr.bf16.mxu1 %v2099_v1  ;;  %v1792_v4 = vld [vmem:[#allocation5 + $0x94] ss:$12 sps:$4 sm:$0xff]   ;;  %v1794_v5 = vld [vmem:[#allocation5 + $0x90] ss:$12 sps:$4 sm:$0xff]  }
  0x7a   : > { %1788 = vset.pattern.permute.xlu0 %v2098_v0  ;;  %654 = vmatprep.subr.bf16.mxu0 %v1789_v2  ;;  %v1795_v6 = vld [vmem:[#allocation5 + $0x7c] ss:$12 sps:$4 sm:$0xff]   ;;  %v1797_v7 = vld [vmem:[#allocation5 + $0x78] ss:$12 sps:$4 sm:$0xff]   ;;  %v1800_v9 = vld [vmem:[#allocation5 + $0x60] ss:$12 sps:$4 sm:$0xff]  }
  0x7b   : > { %655 = vmatpush1.bf16.msra.mxu0 %v1791_v3  ;;  %v1798_v8 = vld [vmem:[#allocation5 + $0x64] ss:$12 sps:$4 sm:$0xff]   ;;  %v1801_v11 = vld [vmem:[#allocation5 + $0x4c] ss:$12 sps:$4 sm:$0xff]   ;;  %v1803_v13 = vld [vmem:[#allocation5 + $0x48] ss:$12 sps:$4 sm:$0xff]  }
  0x7c   : > { %656 = vmatprep.subr.bf16.mxu0 %v1792_v4  ;;  %v1813_v10 = vld [vmem:[#allocation5 + $0xb0] ss:$12 sps:$4 sm:$0xff]   ;;  %v1814_v12 = vld [vmem:[#allocation5 + $0x98] ss:$12 sps:$4 sm:$0xff]   ;;  %v1804_v14 = vld [vmem:[#allocation5 + $0x34] ss:$12 sps:$4 sm:$0xff]  }
  0x7d   : > { %1640 = vmatpush3.bf16.msra.mxu1 %v1813_v10  ;;  %v1806_v15 = vld [vmem:[#allocation5 + $0x30] ss:$12 sps:$4 sm:$0xff]   ;;  %v1815_v16 = vld [vmem:[#allocation5 + $0x80] ss:$12 sps:$4 sm:$0xff]   ;;  %v1816_v18 = vld [vmem:[#allocation5 + $0x68] ss:$12 sps:$4 sm:$0xff]  }
  0x7e   : > { %1641 = vmatprep.subr.bf16.mxu1 %v2099_v1  ;;  %v1807_v17 = vld [vmem:[#allocation5 + $0x1c] ss:$12 sps:$4 sm:$0xff]   ;;  %v1809_v19 = vld [vmem:[#allocation5 + $0x18] ss:$12 sps:$4 sm:$0xff]   ;;  %v1812_v22 = vld [vmem:[#allocation5] ss:$12 sps:$4 sm:$0xff]  }
  0x7f   : > { %657 = vmatpush1.bf16.msra.mxu0 %v1794_v5  ;;  %v1810_v20 = vld [vmem:[#allocation5 + $0x4] ss:$12 sps:$4 sm:$0xff]   ;;  %v1819_v26 = vld [vmem:[#allocation5 + $0x20] ss:$12 sps:$4 sm:$0xff]   ;;  %v1820_v27 = vld [vmem:[#allocation5 + $0x8] ss:$12 sps:$4 sm:$0xff]  }
  0x80   : > { %658 = vmatprep.subr.bf16.mxu0 %v1795_v6  ;;  %v1817_v21 = vld [vmem:[#allocation5 + $0x50] ss:$12 sps:$4 sm:$0xff]   ;;  %v1818_v24 = vld [vmem:[#allocation5 + $0x38] ss:$12 sps:$4 sm:$0xff]   ;;  %vm2100_vm0 = vmmov 0   ;;  %p471_p8 = scmp.lt.s32.totalorder %s2184_s23, 1 }
  0x81   : > { %1642 = vmatpush3.bf16.msra.mxu1 %v1814_v12  ;;  %v2338_v23 = vld [vmem:[%s2317_s19] sm:$0xff]  ;;  %1655 = vmatprep.mubr.msk.bf16.mxu1 %vm2100_vm0, %v2099_v1  ;;  %v2359_v30 = vshrl.u32 %v511_v29, 7  ;;  %vm808_vm1 = vcmask 1043456   ;;  %v779_v54 = vand.u32 127, %v511_v29  ;;  %v2101_v57 = vmov -1e+09  }
  0x82   : > { %1643 = vmatprep.subr.bf16.mxu1 %v2099_v1  ;;  %v476_v25 = vpack.c.bf16 %v2338_v23, %v2338_v23  ;;  %s472_s2 = scalar_select %p471_p8, %s2184_s23, 1  ;;  %v509_v32 = vld [vmem:[%s2457_s3] sm:$0x7]  ;;  %vm791_vm3 = vcmask 64512   ;;  %v1823_v10 = vld [vmem:[#allocation7 + $0x28] sm:$0xff]   ;;  %v1825_v12 = vld [vmem:[#allocation7 + $0x18] sm:$0xff]  }
  0x83   : > { %659 = vmatpush1.bf16.msra.mxu0 %v1797_v7  ;;  %v517_v31 = vsub.s32 1, %v2359_v30  ;;  %v2368_v34 = vsub.s32 0, %v2359_v30  ;;  %v521_v44 = vsub.s32 2, %v2359_v30  ;;  %s1592_s22 = sshll.u32 %s2184_s23, 7  ;;  %s470_s28 = scalar_lea.vmem [#allocation11], %s1511_s25 }
  0x84   : > { %660 = vmatprep.subr.bf16.mxu0 %v1798_v8  ;;  %s473_s24 = scalar_lea.vmem %s2455_s1, %s472_s2  ;;  %v1821_v8 = vld [vmem:[#allocation7 + $0x38] sm:$0xff]   ;;  %s1384_s21 = sshll.u32 %s470_s28, 4  ;;  %s1385_s21 = int_to_ptr.vmem [resolvable:$true] %s1384_s21 }
  0x85   : > { %1644 = vmatpush3.bf16.msra.mxu1 %v1815_v16  ;;  %v780_v28 = vld [vmem:[%s473_s24] sm:$0x1]  ;;  %v518_v33 = vrot.slane %v509_v32, %v517_v31  ;;  %v514_v38 = vrot.slane %v509_v32, %v2368_v34  ;;  %v522_v45 = vrot.slane %v509_v32, %v521_v44  ;;  %v1840_v44 = vld [vmem:[#allocation8 + $0x44] ss:$8 sps:$4 sm:$0xff]   ;;  %s1382_s13 = scalar_lea.hbm %s2465_s11, %s1592_s22  ;;  %s1371_s14 = scalar_lea.sflag [#allocation4], %s2311_s9 }
  0x86   : > { %1645 = vmatprep.subr.bf16.mxu1 %v2099_v1  ;;  %782 = vperm.xlu0 %1788, %v780_v28   ;;  %s2013_s19 = scalar_lea.vmem %s1385_s21, 128  ;;  %p2494_p10 = scmp.ne.s32.totalorder %s2485_s26, 0 }
  0x87   : > { %661 = vmatpush1.bf16.msra.mxu0 %v1800_v9  ;;  %v1822_v9 = vld [vmem:[#allocation7 + $0x30] sm:$0xff]   ;;  %p2014_p7 = scmp.ne.s32.totalorder %s1385_s21, %s2013_s19  ;;  %s2102_s2 = smov [#allocation11]  }
  0x88   : > { %662 = vmatprep.subr.bf16.mxu0 %v1801_v11  ;;  %v1824_v11 = vld [vmem:[#allocation7 + $0x20] sm:$0xff]   ;;  %s2017_s4 = sshll.u32 %s2102_s2, 4  ;;  %s2018_s4 = int_to_ptr.vmem [resolvable:$false] %s2017_s4 }
  0x89   : > { %1646 = vmatpush3.bf16.msra.mxu1 %v1816_v18  ;;  %p2015_p0 = pnand %p2014_p7, %p2494_p10  ;;  %s2019_s23 = scalar_lea.vmem %s2018_s4, 256 }
  0x8a   : > { %1647 = vmatprep.subr.bf16.mxu1 %v2099_v1  ;;  %p2020_p2 = scmp.lt.s32.totalorder %s1385_s21, %s2018_s4  ;;  %p2021_p9 = scmp.lt.s32.totalorder %s2019_s23, %s2013_s19 }
  0x8b   : > { %663 = vmatpush1.bf16.msra.mxu0 %v1803_v13  ;;  %v1826_v13 = vld [vmem:[#allocation7 + $0x10] sm:$0xff]   ;;  %p2016_p12 = pneg %p2015_p0 }
  0x8c   : > { %664 = vmatprep.subr.bf16.mxu0 %v1804_v14  ;;  %v1827_v14 = vld [vmem:[#allocation7 + $0x8] sm:$0xff]   ;;  %p2022_p11 = por %p2021_p9, %p2020_p2 }
  0x8d   : > { %1648 = vmatpush3.bf16.msra.mxu1 %v1817_v21 }
  0x8e   : > { %1649 = vmatprep.subr.bf16.mxu1 %v2099_v1  ;;  %p2023_p13 = pnand %p2022_p11, %p2016_p12 }
  0x8f   : > { %665 = vmatpush1.bf16.msra.mxu0 %v1806_v15 }
  0x90   : > { %666 = vmatprep.subr.bf16.mxu0 %v1807_v17 }
  0x91   : > { %1650 = vmatpush3.bf16.msra.mxu1 %v1818_v24 }
  0x92   : > { %1651 = vmatprep.subr.bf16.mxu1 %v2099_v1 }
  0x93   : > { %667 = vmatpush1.bf16.msra.mxu0 %v1809_v19  ;;  %v1828_v19 = vld [vmem:[#allocation7] sm:$0xff]  }
  0x94   : > { %668 = vmatprep.subr.bf16.mxu0 %v1810_v20 }
  0x95   : > { %1652 = vmatpush3.bf16.msra.mxu1 %v1819_v26 }
  0x96   : > { %1653 = vmatprep.subr.bf16.mxu1 %v2099_v1 }
  0x97   : > { %669 = vmatpush1.bf16.msra.mxu0 %v1812_v22 }
  0x98   : > { %1671 = vmatprep.subr.bf16.mxu0 %v2099_v1 }
  0x99   : > { %1654 = vmatpush3.bf16.msra.mxu1 %v1820_v27 }
  0x9a   : > { %687 = vmatmul.mubr.bf16.vlgmr.msra.gmra.mxu0 %v476_v25  ;;  %1659 = vmatprep.subr.bf16.mxu1 %v2099_v1 }
  0x9b   : > { %1687 = vmatprep.mubr.msk.bf16.mxu0 %vm2100_vm0, %v2099_v1  ;;  %1672 = vmatpush3.bf16.msra.mxu0 %v1821_v8  ;;  %v1860_v8 = vld [vmem:[#allocation10 + $0x20] sm:$0xff]  }
  0x9c   : > { %1656 = vmatmul.mubr.bf16.vlgmr.msra.gmra.mxu1 %v476_v25  ;;  %1673 = vmatprep.subr.bf16.mxu0 %v2099_v1 }
  0x9d   : > { %1661 = vmatprep.mubr.msk.bf16.mxu1 %vm2100_vm0, %v2099_v1 }
  0x9f   : > { %1674 = vmatpush3.bf16.msra.mxu0 %v1822_v9  ;;  %v1861_v9 = vld [vmem:[#allocation10 + $0x58] sm:$0xff]  }
  0xa0   : > { %1675 = vmatprep.subr.bf16.mxu0 %v2099_v1 }
  0xa3   : > { %1676 = vmatpush3.bf16.msra.mxu0 %v1823_v10  ;;  %v1862_v10 = vld [vmem:[#allocation10 + $0x18] sm:$0xff]  }
  0xa4   : > { %1677 = vmatprep.subr.bf16.mxu0 %v2099_v1 }
  0xa7   : > { %1678 = vmatpush3.bf16.msra.mxu0 %v1824_v11  ;;  %v1863_v11 = vld [vmem:[#allocation10 + $0x50] sm:$0xff]  }
  0xa8   : > { %1679 = vmatprep.subr.bf16.mxu0 %v2099_v1 }
  0xab   : > { %1680 = vmatpush3.bf16.msra.mxu0 %v1825_v12  ;;  %v1864_v12 = vld [vmem:[#allocation10 + $0x10] sm:$0xff]  }
  0xac   : > { %1681 = vmatprep.subr.bf16.mxu0 %v2099_v1 }
  0xaf   : > { %1682 = vmatpush3.bf16.msra.mxu0 %v1826_v13  ;;  %v1865_v13 = vld [vmem:[#allocation10 + $0x48] sm:$0xff]  }
  0xb0   : > { %1683 = vmatprep.subr.bf16.mxu0 %v2099_v1 }
  0xb3   : > { %1684 = vmatpush3.bf16.msra.mxu0 %v1827_v14  ;;  %v1866_v14 = vld [vmem:[#allocation10 + $0x8] sm:$0xff]  }
  0xb4   : > { %1685 = vmatprep.subr.bf16.mxu0 %v2099_v1 }
  0xb7   : > { %1686 = vmatpush3.bf16.msra.mxu0 %v1828_v19 }
 0x101   : > { %v783_v53 = vpop.permute.xlu0 %782 }
 0x102   : > { %v787_v55 = vrot.slane %v783_v53, %v2368_v34 }
 0x104   : > { %vm788_vm2 = vcmp.lt.s32.totalorder %v779_v54, %v787_v55 }
 0x105   : > { %v789_v58 = vsel %vm788_vm2, 0.0, %v2101_v57  ;;  %v1552_v57 = vld [vmem:[%s2460_s6] ss:$0 sm:$0xff] }
 0x15a   : > { %v688_v35 = vpop.f32.mrf.mxu0 }
 0x15b   : > { %v689_v42 = vadd.f32 %v688_v35, %v514_v38  ;;  %v1831_v35 = vld [vmem:[#allocation8 + $0x74] ss:$8 sps:$4 sm:$0xff]  }
 0x15c   : > { %v690_v36 = vpop.f32.mrf.mxu0  ;;  %v729_v46 = vpop.f32.mrf.mxu1 }
 0x15d   : > { %v691_v37 = vadd.f32 %v690_v36, %v518_v33  ;;  %v735_v43 = vpack.c.bf16 %v689_v42, %v689_v42  ;;  %v730_v47 = vadd.f32 %v729_v46, %v522_v45  ;;  %v1829_v33 = vld [vmem:[#allocation8 + $0x70] ss:$8 sps:$4 sm:$0xff]   ;;  %v1834_v36 = vld [vmem:[#allocation8 + $0x64] ss:$8 sps:$4 sm:$0xff]   ;;  %v1837_v42 = vld [vmem:[#allocation8 + $0x54] ss:$8 sps:$4 sm:$0xff]  }
 0x15e   : > { %v692_v39 = vpop.f32.mrf.mxu0  ;;  %v1657_v48 = vpop.f32.mrf.mxu1  ;;  %v1843_v45 = vld [vmem:[#allocation8 + $0x34] ss:$8 sps:$4 sm:$0xff]   ;;  %v1841_v46 = vld [vmem:[#allocation8 + $0x30] ss:$8 sps:$4 sm:$0xff]  }
 0x15f   : > { %v736_v40 = vpack.c.bf16 %v691_v37, %v691_v37  ;;  %v804_v49 = vpack.c.bf16 %v730_v47, %v730_v47  ;;  %v1832_v37 = vld [vmem:[#allocation8 + $0x60] ss:$8 sps:$4 sm:$0xff]   ;;  %v1846_v47 = vld [vmem:[#allocation8 + $0x24] ss:$8 sps:$4 sm:$0xff]  }
 0x160   : > { %v693_v41 = vpop.f32.mrf.mxu0  ;;  %v732_v50 = vpop.f32.mrf.mxu1  ;;  %v1844_v48 = vld [vmem:[#allocation8 + $0x20] ss:$8 sps:$4 sm:$0xff]  }
 0x161   : > { %1660 = vmatpush3.bf16.xpose.msra.mxu1 %v736_v40  ;;  %v810_v51 = vsel %vm808_vm1, %v804_v49, 0  ;;  %v1849_v49 = vld [vmem:[#allocation8 + $0x14] ss:$8 sps:$4 sm:$0xff]   ;;  %v1847_v50 = vld [vmem:[#allocation8 + $0x10] ss:$8 sps:$4 sm:$0xff]  }
 0x162   : > { %1665 = vmatprep.subr.bf16.mxu1 %v2099_v1  ;;  %v1658_v52 = vpop.f32.mrf.mxu1 }
 0x163   : > { %v1850_v52 = vld [vmem:[#allocation8] ss:$8 sps:$4 sm:$0xff]  }
 0x168   : > { %1662 = vmatmul.mubr.bf16.vlgmr.msra.gmra.mxu1 %v735_v43  ;;  %v1835_v43 = vld [vmem:[#allocation8 + $0x50] ss:$8 sps:$4 sm:$0xff]  }
 0x169   : > { %1667 = vmatprep.mubr.msk.bf16.mxu1 %vm2100_vm0, %v2099_v1  ;;  %1666 = vmatpush3.bf16.msra.mxu1 %v810_v51  ;;  %v1542_v1 = vld [vmem:[%s2459_s5] ss:$0 sm:$0xff]  ;;  %v1852_v51 = vld [vmem:[#allocation8 + $0x4] ss:$8 sps:$4 sm:$0xff]  }
 0x16a   : > { %1103 = vmatprep.subr.bf16.mxu1 %v1831_v35 }
 0x228   : > { %v771_v56 = vpop.f32.mrf.mxu1 }
 0x229   : > { %v777_v59 = vmul.f32 0.088388346, %v771_v56 }
 0x22a   : > { %v1663_v60 = vpop.f32.mrf.mxu1 }
 0x22b   : > { %v790_v61 = vadd.f32 %v789_v58, %v777_v59  ;;  %v1553_v59 = vld [vmem:[%s2460_s6 + $0x1] ss:$0 sm:$0xff] }
 0x22c   : > { %v774_v62 = vpop.f32.mrf.mxu1 }
 0x22d   : > { %v792_v63 = vsel %vm791_vm3, %v790_v61, -inf }
 0x22e   : > { %793 = vmax.xlane.f32.xlu0 %v792_v63  ;;  %v1664_v2 = vpop.f32.mrf.mxu1  ;;  %v1853_v63 = vld [vmem:[#allocation10 + $0x78] sm:$0xff]  }
 0x22f   : > { %v1854_v2 = vld [vmem:[#allocation10 + $0x38] sm:$0xff]   ;;  %1617 = vmatprep.subr.bf16.mxu0 %v1853_v63 }
 0x2b7   : > { %v794_v3 = vpop.xlane.xlu0 %793 }
 0x2b8   : > { %v795_v4 = vsub.f32 %v790_v61, %v794_v3  ;;  %v1855_v3 = vld [vmem:[#allocation10 + $0x70] sm:$0xff]  }
 0x2ba   : > { %v796_v5 = vmul.f32 1.442695, %v795_v4  ;;  %v1856_v4 = vld [vmem:[#allocation10 + $0x30] sm:$0xff]  }
 0x2bc   : > { %1869 = vpow2.f32 %v796_v5  ;;  %v1857_v5 = vld [vmem:[#allocation10 + $0x68] sm:$0xff]  }
 0x2c9   : > { %v1870_v6 = vpop.eup %1869 }
 0x2ca   : > { %v798_v7 = vsel %vm791_vm3, %v1870_v6, 0.0 }
 0x2cb   : > { %799 = vadd.xlane.f32.xlu1 %v798_v7  ;;  %v1859_v7 = vld [vmem:[#allocation10 + $0x60] sm:$0xff]  }
 0x354   : > { %v800_v15 = vpop.xlane.xlu1 %799 }
 0x355   : > { %1871 = vrcp.f32 %v800_v15  ;;  %v1867_v15 = vld [vmem:[#allocation10 + $0x40] sm:$0xff]  }
 0x362   : > { %v1872_v16 = vpop.eup %1871 }
 0x363   : > { %v802_v17 = vmul.f32 %v1872_v16, %v1870_v6  ;;  %v1858_v6 = vld [vmem:[#allocation10 + $0x28] sm:$0xff]   ;;  %v1868_v16 = vld [vmem:[#allocation10] sm:$0xff]  }
 0x365   : > { %v803_v18 = vpack.c.bf16 %v802_v17, %v802_v17  ;;  %v1011_v17 = vld [vmem:[%s2462_s8] sm:$0x3] }
 0x366   : > { %v1020_v19 = vrot.slane %v1011_v17, %v517_v31 }
 0x367   : > { %1668 = vmatmul.mubr.msk.bf16.vlgmr.msra.gmra.mxu1 %vm791_vm3, %v803_v18  ;;  %v1016_v18 = vrot.slane %v1011_v17, %v2368_v34 }
 0x368   : > { %1135 = vmatprep.mubr.bf16.mxu1 %v2098_v0  ;;  %1104 = vmatpush1.bf16.msra.mxu1 %v1829_v33 }
 0x369   : > { %1105 = vmatprep.subr.bf16.mxu1 %v1834_v36 }
 0x36c   : > { %1106 = vmatpush1.bf16.msra.mxu1 %v1832_v37 }
 0x36d   : > { %1107 = vmatprep.subr.bf16.mxu1 %v1837_v42 }
 0x370   : > { %1108 = vmatpush1.bf16.msra.mxu1 %v1835_v43 }
 0x371   : > { %1109 = vmatprep.subr.bf16.mxu1 %v1840_v44 }
 0x427   : > { %v846_v20 = vpop.f32.mrf.mxu1 }
 0x428   : > { %v852_v21 = vpack.c.bf16 %v846_v20, %v846_v20 }
 0x429   : > { %v1669_v22 = vpop.f32.mrf.mxu1 }
 0x42a   : > { %1688 = vmatmul.mubr.bf16.vlgmr.msra.gmra.mxu0 %v852_v21 }
 0x42b   : > { %v849_v24 = vpop.f32.mrf.mxu1  ;;  %1618 = vmatpush3.bf16.msra.mxu0 %v1854_v2 }
 0x42c   : > { %1619 = vmatprep.subr.bf16.mxu0 %v1855_v3 }
 0x42d   : > { %v1670_v25 = vpop.f32.mrf.mxu1 }
 0x42f   : > { %1620 = vmatpush3.bf16.msra.mxu0 %v1856_v4 }
 0x430   : > { %1621 = vmatprep.subr.bf16.mxu0 %v1857_v5 }
 0x433   : > { %1622 = vmatpush3.bf16.msra.mxu0 %v1858_v6 }
 0x434   : > { %1623 = vmatprep.subr.bf16.mxu0 %v1859_v7 }
 0x437   : > { %1624 = vmatpush3.bf16.msra.mxu0 %v1860_v8 }
 0x438   : > { %1625 = vmatprep.subr.bf16.mxu0 %v1861_v9 }
 0x43b   : > { %1626 = vmatpush3.bf16.msra.mxu0 %v1862_v10 }
 0x43c   : > { %1627 = vmatprep.subr.bf16.mxu0 %v1863_v11 }
 0x43f   : > { %1628 = vmatpush3.bf16.msra.mxu0 %v1864_v12 }
 0x440   : > { %1629 = vmatprep.subr.bf16.mxu0 %v1865_v13 }
 0x443   : > { %1630 = vmatpush3.bf16.msra.mxu0 %v1866_v14 }
 0x444   : > { %1631 = vmatprep.subr.bf16.mxu0 %v1867_v15 }
 0x447   : > { %1632 = vmatpush3.bf16.msra.mxu0 %v1868_v16 }
 0x4ea   : > { %v958_v26 = vpop.f32.mrf.mxu0 }
 0x4eb   : > { %v959_v27 = vadd.f32 %v1542_v1, %v958_v26 }
 0x4ec   : > { %v1689_v28 = vpop.f32.mrf.mxu0 }
 0x4ed   : > { %v964_v29 = vadd.f32 %v959_v27, %v2338_v23  ;;  %v1838_v23 = vld [vmem:[#allocation8 + $0x40] ss:$8 sps:$4 sm:$0xff]  }
 0x4ee   : > { %v961_v32 = vpop.f32.mrf.mxu0  ;;  %1110 = vmatpush1.bf16.msra.mxu1 %v1838_v23 }
 0x4ef   : > { %968 = vadd.xlane.f32.xlu1 %v964_v29  ;;  %1111 = vmatprep.subr.bf16.mxu1 %v1843_v45  ;;  %v1570_v45 = vld [vmem:[%s2464_s10] ss:$0 sm:$0xff] }
 0x4f0   : > { %v1690_v0 = vpop.f32.mrf.mxu0 }
 0x4f2   : > { %1112 = vmatpush1.bf16.msra.mxu1 %v1841_v46 }
 0x4f3   : > { %1113 = vmatprep.subr.bf16.mxu1 %v1846_v47 }
 0x4f6   : > { %1114 = vmatpush1.bf16.msra.mxu1 %v1844_v48 }
 0x4f7   : > { %1115 = vmatprep.subr.bf16.mxu1 %v1849_v49 }
 0x4fa   : > { %1116 = vmatpush1.bf16.msra.mxu1 %v1847_v50 }
 0x4fb   : > { %1117 = vmatprep.subr.bf16.mxu1 %v1852_v51 }
 0x4fe   : > { %1118 = vmatpush1.bf16.msra.mxu1 %v1850_v52 }
 0x578   : > { %v969_v38 = vpop.xlane.xlu1 %968 }
 0x579   : > { %v971_v39 = vmul.f32 0.0078125, %v969_v38 }
 0x57b   : > { %v972_v40 = vsub.f32 %v964_v29, %v971_v39 }
 0x57d   : > { %v973_v41 = vmul.f32 %v972_v40, %v972_v40 }
 0x57f   : > { %974 = vadd.xlane.f32.xlu1 %v973_v41 }
 0x608   : > { %v975_v53 = vpop.xlane.xlu1 %974 }
 0x609   : > { %v976_v54 = vmul.f32 0.0078125, %v975_v53 }
 0x60b   : > { %v977_v55 = vadd.f32 1e-12, %v976_v54 }
 0x60d   : > { %1873 = vrsqrt.f32 %v977_v55 }
 0x61a   : > { %v1874_v56 = vpop.eup %1873 }
 0x61b   : > { %v979_v58 = vmul.f32 %v1874_v56, %v972_v40 }
 0x61d   : > { %v986_v60 = vmul.f32 %v1552_v57, %v979_v58 }
 0x61f   : > { %v2397_v61 = vadd.f32 %v1553_v59, %v986_v60  ;;  %v1589_v60 = vld [vmem:[%s2460_s6 + $0x2] ss:$0 sm:$0xff] }
 0x621   : > { %v994_v62 = vpack.c.bf16 %v2397_v61, %v2397_v61 }
 0x623   : > { %1136 = vmatmul.mubr.bf16.vlgmr.msra.gmra.mxu1 %v994_v62 }
 0x6e3   : > { %v1137_v20 = vpop.f32.mrf.mxu1 }
 0x6e4   : > { %v1138_v21 = vadd.f32 %v1137_v20, %v1016_v18 }
 0x6e5   : > { %v1139_v22 = vpop.f32.mrf.mxu1 }
 0x6e6   : > { %v1146_v24 = vmul.f32 0.044715, %v1138_v21  ;;  %v1140_v25 = vadd.f32 %v1139_v22, %v1020_v19  ;;  %v1144_v38 = vmul.f32 0.5, %v1138_v21 }
 0x6e7   : > { %v1141_v1 = vpop.f32.mrf.mxu1 }
 0x6e8   : > { %v1148_v26 = vmul.f32 %v1146_v24, %v1138_v21  ;;  %v1147_v27 = vmul.f32 0.044715, %v1140_v25  ;;  %v1145_v39 = vmul.f32 0.5, %v1140_v25 }
 0x6e9   : > { %v1142_v28 = vpop.f32.mrf.mxu1 }
 0x6ea   : > { %v1150_v29 = vmul.f32 %v1148_v26, %v1138_v21  ;;  %v1149_v32 = vmul.f32 %v1147_v27, %v1140_v25 }
 0x6ec   : > { %v1152_v0 = vadd.f32 %v1150_v29, %v1138_v21  ;;  %v1151_v33 = vmul.f32 %v1149_v32, %v1140_v25 }
 0x6ee   : > { %v1154_v35 = vmul.f32 0.7978846, %v1152_v0  ;;  %v1153_v36 = vadd.f32 %v1151_v33, %v1140_v25 }
 0x6f0   : > { %v1155_v37 = vmul.f32 0.7978846, %v1153_v36  ;;  %1875 = vtanh.f32 %v1154_v35 }
 0x6f2   : > { %1877 = vtanh.f32 %v1155_v37 }
 0x6fd   : > { %v1876_v30 = vpop.eup %1875 }
 0x6fe   : > { %v1158_v31 = vadd.f32 1.0, %v1876_v30 }
 0x6ff   : > { %v1878_v34 = vpop.eup %1877 }
 0x700   : > { %v1159_v40 = vadd.f32 1.0, %v1878_v34  ;;  %v1160_v41 = vmul.f32 %v1158_v31, %v1144_v38 }
 0x702   : > { %v1161_v42 = vmul.f32 %v1159_v40, %v1145_v39  ;;  %v1162_v23 = vpack.c.bf16 %v1160_v41, %v1160_v41 }
 0x704   : > { %v1163_v43 = vpack.c.bf16 %v1161_v42, %v1161_v42 }
 0x706   : > { %1331 = vmatprep.mubr.bf16.mxu0 %v1163_v43 }
 0x707   : > { %1332 = vmatmul.mubr.bf16.vlgmr.msra.gmra.mxu0 %v1162_v23 }
 0x7c7   : > { %v1633_v44 = vpop.f32.mrf.mxu0 }
 0x7c9   : > { %v1634_v46 = vpop.f32.mrf.mxu0 }
 0x7ca   : > { %v1635_v47 = vadd.f32 %v1634_v46, %v1633_v44 }
 0x7cb   : > { %v1636_v48 = vpop.f32.mrf.mxu0 }
 0x7cc   : > { %v1334_v49 = vadd.f32 %v1635_v47, %v1570_v45 }
 0x7cd   : > { %v1637_v50 = vpop.f32.mrf.mxu0 }
 0x7ce   : > { %v1339_v51 = vadd.f32 %v1334_v49, %v2397_v61  ;;  %v1590_v61 = vld [vmem:[%s2460_s6 + $0x3] ss:$0 sm:$0xff] }
 0x7d0   : > { %1344 = vadd.xlane.f32.xlu1 %v1339_v51 }
 0x859   : > { %v1345_v52 = vpop.xlane.xlu1 %1344 }
 0x85a   : > { %v1346_v53 = vmul.f32 0.0078125, %v1345_v52 }
 0x85c   : > { %v1347_v54 = vsub.f32 %v1339_v51, %v1346_v53 }
 0x85e   : > { %v1348_v55 = vmul.f32 %v1347_v54, %v1347_v54 }
 0x860   : > { %1349 = vadd.xlane.f32.xlu1 %v1348_v55 }
 0x8e9   : > { %v1350_v56 = vpop.xlane.xlu1 %1349 }
 0x8ea   : > { %v1351_v57 = vmul.f32 0.0078125, %v1350_v56 }
 0x8ec   : > { %v1352_v58 = vadd.f32 1e-12, %v1351_v57 }
 0x8ee   : > { %1879 = vrsqrt.f32 %v1352_v58 }
 0x8fb   : > { %v1880_v59 = vpop.eup %1879 }
 0x8fc   : > { %v1354_v62 = vmul.f32 %v1880_v59, %v1347_v54 }
 0x8fe   : > { %v1361_v63 = vmul.f32 %v1589_v60, %v1354_v62 }
 0x900   : > { %v1368_v2 = vadd.f32 %v1590_v61, %v1361_v63 }
 0x902   : > { %1369 = vst [vmem:[%s470_s28] sm:$0xff] %v1368_v2 }
 0x903   : > { %2026 = shalt.err (!%p2023_p13)
}
 0x904   : > { %s2027_s25 = scalar_lea.hbm %s1382_s13, 128  ;;  %s2031_s24 = scalar_lea.hbm %s2465_s11, 256 }
 0x905   : > { %p2028_p1 = scmp.ne.s32.totalorder %s1382_s13, %s2027_s25  ;;  %p2032_p6 = scmp.lt.s32.totalorder %s1382_s13, %s2465_s11 }
 0x906   : > { %p2033_p5 = scmp.lt.s32.totalorder %s2031_s24, %s2027_s25 }
 0x907   : > { %p2029_p3 = pnand %p2028_p1, %p2494_p10 }
 0x908   : > { %p2034_p8 = por %p2033_p5, %p2032_p6 }
 0x909   : > { %p2030_p4 = pneg %p2029_p3 }
 0x90b   : > { %p2035_p7 = pnand %p2034_p8, %p2030_p4 }
 0x90d   : > { %2038 = shalt.err (!%p2035_p7)
}
 0x90e   : > { %1709 = dma.vmem_to_hbm [thread:$0]  (%p2494_p10), %s1385_s21, 128, %s1382_s13, %s1371_s14  }
 0x90f PF: > { %s1396_s22 = sand.u32 1, %s2073_s17   ;;  %p2495_p0 = scmp.ne.s32.totalorder %s2486_s16, 0 }
 0x910   : > { %p2496_p12 = scmp.ge.s32.totalorder %s2085_s20, 2  ;;  %s1397_s28 = scalar_lea.sflag [#allocation4], %s1396_s22 }
 0x912   : > { %p1729_p2 = pnand %p2496_p12, %p2495_p0 }
 0x914   : > { %p1730_p9 = pneg %p1729_p2 }
 0x916   : > { %2068 = dma.done.wait (%p1730_p9), %s1397_s28, 128  }
 0x917   : > { %2070 = vsyncadd (%p1730_p9), %s1397_s28, 4294967168  ;;  %s2497_s29 = sld [smem:[#allocation16_spill]]  ;;  %p26_p11 = scmp.ge.s32.totalorder %s2248_s27, 4  }
 0x918   : > { %s2498_s19 = sld [smem:[#allocation17_spill]]  ;;  %s2499_s17 = smov %s2077_s18 }
 0x919   : > { %s2501_s20 = smov %s2248_s27  ;;  %28 = sbr.rel (!%p26_p11) target bundleno = 12 (0xc), region = 131 }
 0x91d   : > { %s2500_s18 = smov %s2497_s29 }
 0x91e   :  { %1402 = vsyncpa [#allocation3], 1 }
 0x91f   :  { %1404 = vsyncpa [#allocation3 + $0x1], 1 }
 0x920   :  { %1405 = vsyncpa [#allocation6], 1 }
 0x921   :  { %1406 = vsyncpa [#allocation9], 1 }
 0x922   :  { %1407 = vsyncpa [#allocation4], 1 }
 0x923   :  { %1409 = vsyncpa [#allocation4 + $0x1], 1 }

</bundles_post_ra>
